<compile_context>
chip_gen: v5e
topology: v5e:2x2
jax: 0.10.0
libtpu: 0.0.40
codegen_flags: <defaults>
</compile_context>

<pallas_src>
import functools

import jax
import jax.numpy as jnp
from jax.experimental import pallas as pl
from jax.experimental.pallas import tpu as pltpu


def _round_up(x, m):
    return ((x + m - 1) // m) * m


# ----------------------------------------------------------------------------
# Fused kernel: mean-pool history -> 3-layer MLP (MXU, bf16) -> sampled-softmax
# per-row loss contribution. One batch tile per grid step.
# ----------------------------------------------------------------------------
def fused_kernel(hist_ref, aux_ref, cand_ref,
                 w1h_ref, w1a_ref, b1_ref, w2_ref, b2_ref, w3_ref, b3_ref,
                 hidden_ref, rowloss_ref, *, context_size):
    f32 = jnp.float32
    bf16 = jnp.bfloat16

    # ---- hidden tower -------------------------------------------------------
    # mean over history axis: (TB, Hist, E) -> (TB, E)
    hist_mean = jnp.mean(hist_ref[...], axis=1)

    # concat([hist_mean, disc, real]) @ W1  ==  two summed matmuls (disc+real
    # were concatenated in glue and their W1 rows merged into w1a).
    x1 = (jnp.dot(hist_mean.astype(bf16), w1h_ref[...],
                  preferred_element_type=f32)
          + jnp.dot(aux_ref[...].astype(bf16), w1a_ref[...],
                    preferred_element_type=f32)
          + b1_ref[...])
    h1 = jnp.maximum(x1, 0.0)

    h2 = jnp.maximum(
        jnp.dot(h1.astype(bf16), w2_ref[...], preferred_element_type=f32)
        + b2_ref[...], 0.0)
    h3 = jnp.maximum(
        jnp.dot(h2.astype(bf16), w3_ref[...], preferred_element_type=f32)
        + b3_ref[...], 0.0)

    hidden_ref[...] = h3.astype(hidden_ref.dtype)

    # ---- SampledSoftmaxLoss (per-row partial, finalized in the wrapper) -----
    # cand_ref: (TB, P, E), first `context_size` candidates are positives,
    # the remaining C*NN are negatives (sign flipped, matching torch's .neg()).
    scores = jnp.sum(cand_ref[...] * h3[:, None, :], axis=-1)        # (TB, P)
    col = jax.lax.broadcasted_iota(jnp.int32, scores.shape, 1)
    signed = jnp.where(col < context_size, scores, -scores)

    # stable log-sigmoid: log(sigmoid(x)) = min(x, 0) - log1p(exp(-|x|))
    logsig = jnp.minimum(signed, 0.0) - jnp.log1p(jnp.exp(-jnp.abs(signed)))

    # p_loss + n_loss per row == (1/C) * sum over all P candidates of logsig
    rowloss_ref[...] = (jnp.sum(logsig, axis=-1, keepdims=True)
                        * (1.0 / context_size)).astype(rowloss_ref.dtype)


def run_fused(hist_emb, aux_feat, cand_emb,
              w1h, w1a, b1, w2, b2, w3, b3, *, context_size):
    B, HIST, E = hist_emb.shape
    Fa = aux_feat.shape[1]
    P = cand_emb.shape[1]
    E_out = w3.shape[1]

    # batch tile: multiple of 8 sublanes, capped at 128 rows (fits all chips,
    # incl. v7x 64 MiB VMEM at production batch sizes).
    TB = 128 if B >= 128 else _round_up(B, 8)
    B_pad = _round_up(B, TB)
    if B_pad != B:
        pad = B_pad - B
        hist_emb = jnp.pad(hist_emb, ((0, pad), (0, 0), (0, 0)))
        aux_feat = jnp.pad(aux_feat, ((0, pad), (0, 0)))
        cand_emb = jnp.pad(cand_emb, ((0, pad), (0, 0), (0, 0)))

    grid = (B_pad // TB,)
    kernel = functools.partial(fused_kernel, context_size=context_size)

    batch3 = lambda i: (i, 0, 0)
    batch2 = lambda i: (i, 0)
    const2 = lambda i: (0, 0)

    hidden, rowloss = pl.pallas_call(
        kernel,
        out_shape=(jax.ShapeDtypeStruct((B_pad, E_out), jnp.float32),
                   jax.ShapeDtypeStruct((B_pad, 1), jnp.float32)),
        grid_spec=pltpu.PrefetchScalarGridSpec(
            num_scalar_prefetch=0,
            grid=grid,
            in_specs=[
                pl.BlockSpec((TB, HIST, E), batch3),   # history embeddings
                pl.BlockSpec((TB, Fa), batch2),        # disc + real features
                pl.BlockSpec((TB, P, E), batch3),      # pos|neg candidates
                pl.BlockSpec(w1h.shape, const2),       # VMEM-resident weights
                pl.BlockSpec(w1a.shape, const2),
                pl.BlockSpec(b1.shape, const2),
                pl.BlockSpec(w2.shape, const2),
                pl.BlockSpec(b2.shape, const2),
                pl.BlockSpec(w3.shape, const2),
                pl.BlockSpec(b3.shape, const2),
            ],
            out_specs=(pl.BlockSpec((TB, E_out), batch2),
                       pl.BlockSpec((TB, 1), batch2)),
        ),
        compiler_params=pltpu.CompilerParams(
            dimension_semantics=("parallel",),
            vmem_limit_bytes=48 * 1024 * 1024,
        ),
    )(hist_emb, aux_feat, cand_emb, w1h, w1a, b1, w2, b2, w3, b3)
    return hidden, rowloss


# ----------------------------------------------------------------------------
# Full model wrapper (glue: embedding gathers, negative sampling, W1 split).
# ----------------------------------------------------------------------------
@functools.partial(jax.jit, static_argnames=("num_negatives",))
def youtube_net_forward(params, history, positives, discrete_features,
                        real_value_features, neg_key, num_negatives=5):
    item_emb = params["item_emb"]                              # (num_items, E)
    num_items, E = item_emb.shape
    B, C = positives.shape

    # --- feature gathers (glue) ---
    hist_emb = jnp.take(item_emb, history, axis=0)             # (B, Hist, E)
    disc_parts = [jnp.take(tbl, feat, axis=0)                  # each (B, Dd)
                  for tbl, feat in zip(params["disc_embs"], discrete_features)]
    aux_feat = jnp.concatenate(disc_parts + [real_value_features], axis=-1)
    Fa = aux_feat.shape[1]

    # --- negative sampling (padding=True -> uniform in [1, num_items-1)) ---
    # TODO(synk): torch samples negatives with torch's RNG; here jax.random is used.
    negatives = jax.random.uniform(
        neg_key, (B, C * num_negatives),
        minval=1.0, maxval=float(num_items - 1)).astype(jnp.int32)

    loss_emb = params["loss_emb"]                              # (num_items, E)
    pos_emb = jnp.take(loss_emb, positives, axis=0)            # (B, C, E)
    neg_emb = jnp.take(loss_emb, negatives, axis=0)            # (B, C*NN, E)
    cand_emb = jnp.concatenate([pos_emb, neg_emb], axis=1)     # (B, C+C*NN, E)

    # split W1: history rows vs. (discrete + real) rows; bf16 for MXU.
    w1 = params["w1"]                                          # (F, 4E)
    w1h = w1[:E].astype(jnp.bfloat16)
    w1a = w1[E:E + Fa].astype(jnp.bfloat16)
    w2 = params["w2"].astype(jnp.bfloat16)
    w3 = params["w3"].astype(jnp.bfloat16)

    hidden_pad, rowloss_pad = run_fused(
        hist_emb, aux_feat, cand_emb,
        w1h, w1a, params["b1"], w2, params["b2"], w3, params["b3"],
        context_size=C)

    hidden = hidden_pad[:B]                                    # (B, E)
    loss = -jnp.mean(rowloss_pad[:B, 0])                       # scalar
    return loss, hidden


# ----------------------------------------------------------------------------
# Deterministic parameter init + demo
# ----------------------------------------------------------------------------
def init_params(key, num_items, item_emb_dims, discrete_vocab_sizes,
                discrete_emb_dims, num_real_values):
    keys = jax.random.split(key, 12)
    E = item_emb_dims
    feat_dims = E + len(discrete_vocab_sizes) * discrete_emb_dims + num_real_values
    h1, h2, h3 = E * 4, E * 2, E

    def lin(kw, kb, fan_in, fan_out):
        bound = 1.0 / jnp.sqrt(fan_in)
        w = jax.random.uniform(kw, (fan_in, fan_out), minval=-bound, maxval=bound,
                               dtype=jnp.float32)
        b = jax.random.uniform(kb, (1, fan_out), minval=-bound, maxval=bound,
                               dtype=jnp.float32)
        return w, b

    w1, b1 = lin(keys[0], keys[1], feat_dims, h1)
    w2, b2 = lin(keys[2], keys[3], h1, h2)
    w3, b3 = lin(keys[4], keys[5], h2, h3)

    init_range = 0.5 / E
    params = {
        "item_emb": jax.random.normal(keys[6], (num_items, E), dtype=jnp.float32),
        "disc_embs": [
            jax.random.normal(jax.random.fold_in(keys[7], i),
                              (vs, discrete_emb_dims), dtype=jnp.float32)
            for i, vs in enumerate(discrete_vocab_sizes)
        ],
        "w1": w1, "b1": b1, "w2": w2, "b2": b2, "w3": w3, "b3": b3,
        "loss_emb": jax.random.uniform(keys[8], (num_items, E),
                                       minval=-init_range, maxval=init_range,
                                       dtype=jnp.float32),
    }
    return params


if __name__ == "__main__":
    key = jax.random.PRNGKey(0)
    k_param, k_hist, k_pos, k_disc, k_real, k_neg = jax.random.split(key, 6)

    # small config
    num_items = 1000
    item_emb_dims = 32
    discrete_vocab_sizes = [10, 10]
    discrete_emb_dims = 8
    num_real_values = 4
    num_negatives = 5
    B, HIST, C = 8, 8, 2

    params = init_params(k_param, num_items, item_emb_dims,
                         discrete_vocab_sizes, discrete_emb_dims, num_real_values)

    history = jax.random.randint(k_hist, (B, HIST), 0, num_items, dtype=jnp.int32)
    positives = jax.random.randint(k_pos, (B, C), 1, num_items, dtype=jnp.int32)
    discrete_features = [
        jax.random.randint(jax.random.fold_in(k_disc, i), (B,), 0, vs, dtype=jnp.int32)
        for i, vs in enumerate(discrete_vocab_sizes)
    ]
    real_value_features = jax.random.normal(k_real, (B, num_real_values),
                                            dtype=jnp.float32)

    loss, hidden = youtube_net_forward(params, history, positives,
                                       discrete_features, real_value_features,
                                       k_neg, num_negatives=num_negatives)
    jax.block_until_ready((loss, hidden))
    assert hidden.shape == (B, item_emb_dims)
    assert loss.shape == ()
    assert bool(jnp.isfinite(loss))
    print("KERNEL_OK")
</pallas_src>

<mosaic_0001>
module attributes {stable_mosaic.version = 11 : i64} {
  func.func @fused_kernel(%arg0: i32, %arg1: memref<8x8x32xf32, #tpu.memory_space<vmem>>, %arg2: memref<8x20xf32, #tpu.memory_space<vmem>>, %arg3: memref<8x12x32xf32, #tpu.memory_space<vmem>>, %arg4: memref<32x128xbf16, #tpu.memory_space<vmem>>, %arg5: memref<20x128xbf16, #tpu.memory_space<vmem>>, %arg6: memref<1x128xf32, #tpu.memory_space<vmem>>, %arg7: memref<128x64xbf16, #tpu.memory_space<vmem>>, %arg8: memref<1x64xf32, #tpu.memory_space<vmem>>, %arg9: memref<64x32xbf16, #tpu.memory_space<vmem>>, %arg10: memref<1x32xf32, #tpu.memory_space<vmem>>, %arg11: memref<8x32xf32, #tpu.memory_space<vmem>>, %arg12: memref<8x1xf32, #tpu.memory_space<vmem>>) attributes {dimension_semantics = [#tpu.dimension_semantics<parallel>], iteration_bounds = array<i64: 1>, scalar_prefetch = 0 : i64, scratch_operands = 0 : i64, tpu.core_type = #tpu.core_type<tc>, window_params = [{transform_indices = @transform_0, window_bounds = array<i64: 8, 8, 32>}, {transform_indices = @transform_1, window_bounds = array<i64: 8, 20>}, {transform_indices = @transform_2, window_bounds = array<i64: 8, 12, 32>}, {pipeline_mode = #tpu.pipeline_mode<synchronous>, transform_indices = @transform_3, window_bounds = array<i64: 32, 128>}, {pipeline_mode = #tpu.pipeline_mode<synchronous>, transform_indices = @transform_4, window_bounds = array<i64: 20, 128>}, {pipeline_mode = #tpu.pipeline_mode<synchronous>, transform_indices = @transform_5, window_bounds = array<i64: 1, 128>}, {pipeline_mode = #tpu.pipeline_mode<synchronous>, transform_indices = @transform_6, window_bounds = array<i64: 128, 64>}, {pipeline_mode = #tpu.pipeline_mode<synchronous>, transform_indices = @transform_7, window_bounds = array<i64: 1, 64>}, {pipeline_mode = #tpu.pipeline_mode<synchronous>, transform_indices = @transform_8, window_bounds = array<i64: 64, 32>}, {pipeline_mode = #tpu.pipeline_mode<synchronous>, transform_indices = @transform_9, window_bounds = array<i64: 1, 32>}, {transform_indices = @transform_10, window_bounds = array<i64: 8, 32>}, {transform_indices = @transform_11, window_bounds = array<i64: 8, 1>}]} {
    %c0 = arith.constant 0 : index
    %c0_0 = arith.constant 0 : index
    %c0_1 = arith.constant 0 : index
    %0 = vector.load %arg1[%c0, %c0_0, %c0_1] : memref<8x8x32xf32, #tpu.memory_space<vmem>>, vector<8x8x32xf32>
    %cst = arith.constant dense<0.000000e+00> : vector<8x32xf32>
    %1 = vector.multi_reduction <add>, %0, %cst [1] : vector<8x8x32xf32> to vector<8x32xf32>
    %cst_2 = arith.constant 8.000000e+00 : f32
    %2 = vector.broadcast %cst_2 : f32 to vector<8x32xf32>
    %3 = arith.divf %1, %2 : vector<8x32xf32>
    %4 = arith.truncf %3 : vector<8x32xf32> to vector<8x32xbf16>
    %c0_3 = arith.constant 0 : index
    %c0_4 = arith.constant 0 : index
    %5 = vector.load %arg4[%c0_3, %c0_4] : memref<32x128xbf16, #tpu.memory_space<vmem>>, vector<32x128xbf16>
    %cst_5 = arith.constant dense<0.000000e+00> : vector<8x128xf32>
    %6 = tpu.matmul %4, %5, %cst_5 {dimension_numbers = #tpu.dot_dimension_numbers<[1], [0], [0], [1], [0, 0, 1, 1], [], []>} : vector<8x32xbf16>, vector<32x128xbf16>, vector<8x128xf32> -> vector<8x128xf32>
    %c0_6 = arith.constant 0 : index
    %c0_7 = arith.constant 0 : index
    %7 = vector.load %arg2[%c0_6, %c0_7] : memref<8x20xf32, #tpu.memory_space<vmem>>, vector<8x20xf32>
    %8 = arith.truncf %7 : vector<8x20xf32> to vector<8x20xbf16>
    %c0_8 = arith.constant 0 : index
    %c0_9 = arith.constant 0 : index
    %9 = vector.load %arg5[%c0_8, %c0_9] : memref<20x128xbf16, #tpu.memory_space<vmem>>, vector<20x128xbf16>
    %cst_10 = arith.constant dense<0.000000e+00> : vector<8x128xf32>
    %10 = tpu.matmul %8, %9, %cst_10 {dimension_numbers = #tpu.dot_dimension_numbers<[1], [0], [0], [1], [0, 0, 1, 1], [], []>} : vector<8x20xbf16>, vector<20x128xbf16>, vector<8x128xf32> -> vector<8x128xf32>
    %11 = arith.addf %6, %10 : vector<8x128xf32>
    %c0_11 = arith.constant 0 : index
    %c0_12 = arith.constant 0 : index
    %12 = vector.load %arg6[%c0_11, %c0_12] : memref<1x128xf32, #tpu.memory_space<vmem>>, vector<1x128xf32>
    %13 = vector.broadcast %12 : vector<1x128xf32> to vector<8x128xf32>
    %14 = arith.addf %11, %13 : vector<8x128xf32>
    %cst_13 = arith.constant 0.000000e+00 : f32
    %15 = vector.broadcast %cst_13 : f32 to vector<8x128xf32>
    %16 = arith.maximumf %14, %15 : vector<8x128xf32>
    %17 = arith.truncf %16 : vector<8x128xf32> to vector<8x128xbf16>
    %c0_14 = arith.constant 0 : index
    %c0_15 = arith.constant 0 : index
    %18 = vector.load %arg7[%c0_14, %c0_15] : memref<128x64xbf16, #tpu.memory_space<vmem>>, vector<128x64xbf16>
    %cst_16 = arith.constant dense<0.000000e+00> : vector<8x64xf32>
    %19 = tpu.matmul %17, %18, %cst_16 {dimension_numbers = #tpu.dot_dimension_numbers<[1], [0], [0], [1], [0, 0, 1, 1], [], []>} : vector<8x128xbf16>, vector<128x64xbf16>, vector<8x64xf32> -> vector<8x64xf32>
    %c0_17 = arith.constant 0 : index
    %c0_18 = arith.constant 0 : index
    %20 = vector.load %arg8[%c0_17, %c0_18] : memref<1x64xf32, #tpu.memory_space<vmem>>, vector<1x64xf32>
    %21 = vector.broadcast %20 : vector<1x64xf32> to vector<8x64xf32>
    %22 = arith.addf %19, %21 : vector<8x64xf32>
    %cst_19 = arith.constant 0.000000e+00 : f32
    %23 = vector.broadcast %cst_19 : f32 to vector<8x64xf32>
    %24 = arith.maximumf %22, %23 : vector<8x64xf32>
    %25 = arith.truncf %24 : vector<8x64xf32> to vector<8x64xbf16>
    %c0_20 = arith.constant 0 : index
    %c0_21 = arith.constant 0 : index
    %26 = vector.load %arg9[%c0_20, %c0_21] : memref<64x32xbf16, #tpu.memory_space<vmem>>, vector<64x32xbf16>
    %cst_22 = arith.constant dense<0.000000e+00> : vector<8x32xf32>
    %27 = tpu.matmul %25, %26, %cst_22 {dimension_numbers = #tpu.dot_dimension_numbers<[1], [0], [0], [1], [0, 0, 1, 1], [], []>} : vector<8x64xbf16>, vector<64x32xbf16>, vector<8x32xf32> -> vector<8x32xf32>
    %c0_23 = arith.constant 0 : index
    %c0_24 = arith.constant 0 : index
    %28 = vector.load %arg10[%c0_23, %c0_24] : memref<1x32xf32, #tpu.memory_space<vmem>>, vector<1x32xf32>
    %29 = vector.broadcast %28 : vector<1x32xf32> to vector<8x32xf32>
    %30 = arith.addf %27, %29 : vector<8x32xf32>
    %cst_25 = arith.constant 0.000000e+00 : f32
    %31 = vector.broadcast %cst_25 : f32 to vector<8x32xf32>
    %32 = arith.maximumf %30, %31 : vector<8x32xf32>
    %c0_26 = arith.constant 0 : index
    %c0_27 = arith.constant 0 : index
    %33 = vector.load %arg11[%c0_26, %c0_27] : memref<8x32xf32, #tpu.memory_space<vmem>>, vector<8x32xf32>
    tpu.vector_store %arg11[%c0_26, %c0_27], %32 {strides = array<i32>} : memref<8x32xf32, #tpu.memory_space<vmem>>, vector<8x32xf32>,
    %c0_28 = arith.constant 0 : index
    %c0_29 = arith.constant 0 : index
    %c0_30 = arith.constant 0 : index
    %34 = vector.load %arg3[%c0_28, %c0_29, %c0_30] : memref<8x12x32xf32, #tpu.memory_space<vmem>>, vector<8x12x32xf32>
    %35 = vector.shape_cast %32 : vector<8x32xf32> to vector<8x1x32xf32>
    %36 = vector.broadcast %35 : vector<8x1x32xf32> to vector<8x12x32xf32>
    %37 = arith.mulf %34, %36 : vector<8x12x32xf32>
    %cst_31 = arith.constant dense<0.000000e+00> : vector<8x12xf32>
    %38 = vector.multi_reduction <add>, %37, %cst_31 [2] : vector<8x12x32xf32> to vector<8x12xf32>
    %39 = tpu.iota {dimensions = array<i32: 1>} : vector<8x12xi32>
    %c2_i32 = arith.constant 2 : i32
    %40 = vector.broadcast %c2_i32 : i32 to vector<8x12xi32>
    %41 = arith.cmpi slt, %39, %40 : vector<8x12xi32>
    %cst_32 = arith.constant 0.000000e+00 : f32
    %42 = vector.broadcast %cst_32 : f32 to vector<8x12xf32>
    %43 = arith.subf %42, %38 : vector<8x12xf32>
    %44 = arith.select %41, %38, %43 : vector<8x12xi1>, vector<8x12xf32>
    %cst_33 = arith.constant 0.000000e+00 : f32
    %45 = vector.broadcast %cst_33 : f32 to vector<8x12xf32>
    %46 = arith.minimumf %44, %45 : vector<8x12xf32>
    %47 = math.absf %44 : vector<8x12xf32>
    %cst_34 = arith.constant 0.000000e+00 : f32
    %48 = vector.broadcast %cst_34 : f32 to vector<8x12xf32>
    %49 = arith.subf %48, %47 : vector<8x12xf32>
    %50 = math.exp %49 : vector<8x12xf32>
    %51 = math.log1p %50 : vector<8x12xf32>
    %52 = arith.subf %46, %51 : vector<8x12xf32>
    %cst_35 = arith.constant dense<0.000000e+00> : vector<8xf32>
    %53 = vector.multi_reduction <add>, %52, %cst_35 [1] : vector<8x12xf32> to vector<8xf32>
    %54 = vector.shape_cast %53 : vector<8xf32> to vector<8x1xf32>
    %cst_36 = arith.constant 5.000000e-01 : f32
    %55 = vector.broadcast %cst_36 : f32 to vector<8x1xf32>
    %56 = arith.mulf %54, %55 : vector<8x1xf32>
    %c0_37 = arith.constant 0 : index
    %c0_38 = arith.constant 0 : index
    %57 = vector.load %arg12[%c0_37, %c0_38] : memref<8x1xf32, #tpu.memory_space<vmem>>, vector<8x1xf32>
    tpu.vector_store %arg12[%c0_37, %c0_38], %56 {strides = array<i32>} : memref<8x1xf32, #tpu.memory_space<vmem>>, vector<8x1xf32>,
    return
  }
  func.func @transform_0(%arg0: i32) -> (i32, i32, i32) {
    %c0_i32 = arith.constant 0 : i32
    %c0_i32_0 = arith.constant 0 : i32
    %c0_i32_1 = arith.constant 0 : i32
    return %arg0, %c0_i32, %c0_i32_0 : i32, i32, i32
  }
  func.func @transform_1(%arg0: i32) -> (i32, i32) {
    %c0_i32 = arith.constant 0 : i32
    %c0_i32_0 = arith.constant 0 : i32
    return %arg0, %c0_i32 : i32, i32
  }
  func.func @transform_2(%arg0: i32) -> (i32, i32, i32) {
    %c0_i32 = arith.constant 0 : i32
    %c0_i32_0 = arith.constant 0 : i32
    %c0_i32_1 = arith.constant 0 : i32
    return %arg0, %c0_i32, %c0_i32_0 : i32, i32, i32
  }
  func.func @transform_3(%arg0: i32) -> (i32, i32) {
    %c0_i32 = arith.constant 0 : i32
    %c0_i32_0 = arith.constant 0 : i32
    %c0_i32_1 = arith.constant 0 : i32
    return %c0_i32, %c0_i32_0 : i32, i32
  }
  func.func @transform_4(%arg0: i32) -> (i32, i32) {
    %c0_i32 = arith.constant 0 : i32
    %c0_i32_0 = arith.constant 0 : i32
    %c0_i32_1 = arith.constant 0 : i32
    return %c0_i32, %c0_i32_0 : i32, i32
  }
  func.func @transform_5(%arg0: i32) -> (i32, i32) {
    %c0_i32 = arith.constant 0 : i32
    %c0_i32_0 = arith.constant 0 : i32
    %c0_i32_1 = arith.constant 0 : i32
    return %c0_i32, %c0_i32_0 : i32, i32
  }
  func.func @transform_6(%arg0: i32) -> (i32, i32) {
    %c0_i32 = arith.constant 0 : i32
    %c0_i32_0 = arith.constant 0 : i32
    %c0_i32_1 = arith.constant 0 : i32
    return %c0_i32, %c0_i32_0 : i32, i32
  }
  func.func @transform_7(%arg0: i32) -> (i32, i32) {
    %c0_i32 = arith.constant 0 : i32
    %c0_i32_0 = arith.constant 0 : i32
    %c0_i32_1 = arith.constant 0 : i32
    return %c0_i32, %c0_i32_0 : i32, i32
  }
  func.func @transform_8(%arg0: i32) -> (i32, i32) {
    %c0_i32 = arith.constant 0 : i32
    %c0_i32_0 = arith.constant 0 : i32
    %c0_i32_1 = arith.constant 0 : i32
    return %c0_i32, %c0_i32_0 : i32, i32
  }
  func.func @transform_9(%arg0: i32) -> (i32, i32) {
    %c0_i32 = arith.constant 0 : i32
    %c0_i32_0 = arith.constant 0 : i32
    %c0_i32_1 = arith.constant 0 : i32
    return %c0_i32, %c0_i32_0 : i32, i32
  }
  func.func @transform_10(%arg0: i32) -> (i32, i32) {
    %c0_i32 = arith.constant 0 : i32
    %c0_i32_0 = arith.constant 0 : i32
    return %arg0, %c0_i32 : i32, i32
  }
  func.func @transform_11(%arg0: i32) -> (i32, i32) {
    %c0_i32 = arith.constant 0 : i32
    %c0_i32_0 = arith.constant 0 : i32
    return %arg0, %c0_i32 : i32, i32
  }
}

</mosaic_0001>

<bundles_post_ra>
// kernel: youtube_net_forward.1
= control target key start
LH: loop header
LB: loop body
LE: loop exit
PB: predicated region body
PF: predicated region fallthrough
CT: control target
= control target key end

     0   :  { %vm47_vm0 = vcmask 261120   ;;  %vm149_vm1 = vcmask 1041408   ;;  %v750_v9 = vmov 8.0   ;;  %s1063_s0 = inlined_call_operand.vmem [shape: f32[8,8,32], index: 0, kind: input, shape index: {}]   ;;  %s1064_s1 = inlined_call_operand.vmem [shape: f32[8,20], index: 1, kind: input, shape index: {}]   ;;  %s1065_s2 = inlined_call_operand.vmem [shape: f32[8,12,32], index: 2, kind: input, shape index: {}]   ;;  %s1066_s3 = inlined_call_operand.vmem [shape: bf16[32,128], index: 3, kind: input, shape index: {}]   ;;  %s1067_s4 = inlined_call_operand.vmem [shape: bf16[20,128], index: 4, kind: input, shape index: {}]   ;;  %s1068_s5 = inlined_call_operand.vmem [shape: f32[1,128], index: 5, kind: input, shape index: {}]   ;;  %s1069_s6 = inlined_call_operand.vmem [shape: bf16[128,64], index: 6, kind: input, shape index: {}]   ;;  %s1070_s7 = inlined_call_operand.vmem [shape: f32[1,64], index: 7, kind: input, shape index: {}]   ;;  %s1071_s8 = inlined_call_operand.vmem [shape: bf16[64,32], index: 8, kind: input, shape index: {}]   ;;  %s1072_s9 = inlined_call_operand.vmem [shape: f32[1,32], index: 9, kind: input, shape index: {}]   ;;  %s1073_s10 = inlined_call_operand.hbm [shape: f32[8,32], index: 10, kind: output, shape index: {0}]   ;;  %s1074_s11 = inlined_call_operand.vmem [shape: f32[8,1], index: 11, kind: output, shape index: {1}]  }
   0x1   :  { %v135_v0 = vld [vmem:[%s1067_s4 + $0x8] sm:$0x3]  ;;  %v698_v3 = vld [vmem:[%s1066_s3] sm:$0xff]  ;;  %v41_v6 = vld [vmem:[%s1063_s0 + $0x10] sm:$0xff]  ;;  %718 = vrcp.f32 %v750_v9 }
   0x2   :  { %v141_v1 = vunpack.c.l.b16 %v135_v0  ;;  %v699_v2 = vld [vmem:[%s1066_s3 + $0x8] sm:$0xff]  ;;  %v39_v4 = vld [vmem:[%s1063_s0] sm:$0xff]  ;;  %v42_v7 = vld [vmem:[%s1063_s0 + $0x18] sm:$0xff]  ;;  %v62_v16 = vsel %vm47_vm0, %v41_v6, 0.0 }
   0x3   :  { %v40_v5 = vld [vmem:[%s1063_s0 + $0x8] sm:$0xff]  ;;  %v48_v8 = vsel %vm47_vm0, %v39_v4, 0.0  ;;  %218 = vmatpush.bf16.msra.mxu1 %v699_v2  ;;  %v43_v11 = vld [vmem:[%s1063_s0 + $0x20] sm:$0xff]  ;;  %v45_v13 = vld [vmem:[%s1063_s0 + $0x30] sm:$0xff]  ;;  %v63_v20 = vrot.slane %v62_v16, 4  ;;  %v69_v21 = vsel %vm47_vm0, %v42_v7, 0.0 }
   0x4   :  { %v143_v10 = vpack.c.b16 %v141_v1, %v141_v1  ;;  %v44_v12 = vld [vmem:[%s1063_s0 + $0x28] sm:$0xff]  ;;  %v49_v14 = vrot.slane %v48_v8, 4  ;;  %v55_v15 = vsel %vm47_vm0, %v40_v5, 0.0  ;;  %v700_v17 = vld [vmem:[%s1067_s4] sm:$0xff]  ;;  %v76_v22 = vsel %vm47_vm0, %v43_v11, 0.0  ;;  %v46_v24 = vld [vmem:[%s1063_s0 + $0x38] sm:$0xff] }
   0x5   :  { %v131_v18 = vld [vmem:[%s1064_s1] sm:$0xff]  ;;  %v56_v19 = vrot.slane %v55_v15, 4  ;;  %v70_v26 = vrot.slane %v69_v21, 4  ;;  %v77_v27 = vrot.slane %v76_v22, 4  ;;  %v64_v29 = vadd.f32 %v63_v20, %v62_v16  ;;  %v708_v36 = vld [vmem:[%s1069_s6 + $0x38] sm:$0xff]  ;;  %v707_v46 = vld [vmem:[%s1069_s6 + $0x30] sm:$0xff] }
   0x6   :  { %v151_v23 = vsel %vm149_vm1, %v143_v10, 0  ;;  %v50_v25 = vadd.f32 %v49_v14, %v48_v8  ;;  %v83_v30 = vsel %vm47_vm0, %v44_v12, 0.0  ;;  %v90_v31 = vsel %vm47_vm0, %v45_v13, 0.0  ;;  %300 = vmatpush.bf16.msra.mxu2 %v708_v36 }
   0x7   :  { %159 = vmatpush.bf16.msra.mxu0 %v151_v23  ;;  %v57_v28 = vadd.f32 %v56_v19, %v55_v15  ;;  %219 = vmatpush.bf16.msra.mxu1 %v698_v3  ;;  %v71_v33 = vadd.f32 %v70_v26, %v69_v21  ;;  %v78_v34 = vadd.f32 %v77_v27, %v76_v22  ;;  %v84_v35 = vrot.slane %v83_v30, 4  ;;  %v719_v37 = vpop.eup %718 }
   0x8   :  { %v51_v32 = vrot.slane %v50_v25, 2  ;;  %v65_v39 = vrot.slane %v64_v29, 2  ;;  %v91_v40 = vrot.slane %v90_v31, 4  ;;  %v97_v41 = vsel %vm47_vm0, %v46_v24, 0.0 }
   0x9   :  { %v58_v38 = vrot.slane %v57_v28, 2  ;;  %v132_v42 = vpack.c.bf16 %v131_v18, %v131_v18  ;;  %v72_v43 = vrot.slane %v71_v33, 2  ;;  %v79_v44 = vrot.slane %v78_v34, 2 }
   0xa   :  { %v85_v45 = vadd.f32 %v84_v35, %v83_v30 }
   0xb   :  { %17 = vsyncpa [#allocation3], 0  ;;  %160 = vmatpush.bf16.msra.mxu0 %v700_v17  ;;  %vm145_vm2 = vcmask 162816   ;;  %v92_v47 = vadd.f32 %v91_v40, %v90_v31  ;;  %v98_v48 = vrot.slane %v97_v41, 4  ;;  %v52_v49 = vadd.f32 %v51_v32, %v50_v25  ;;  %301 = vmatpush.bf16.msra.mxu2 %v707_v46  ;;  %v706_v58 = vld [vmem:[%s1069_s6 + $0x28] sm:$0xff]  ;;  %v705_v7 = vld [vmem:[%s1069_s6 + $0x20] sm:$0xff] }
   0xc   :  { %v59_v50 = vadd.f32 %v58_v38, %v57_v28  ;;  %v66_v51 = vadd.f32 %v65_v39, %v64_v29  ;;  %v86_v52 = vrot.slane %v85_v45, 2  ;;  %v73_v53 = vadd.f32 %v72_v43, %v71_v33  ;;  %s622_s27 = sshll.u32 %s1073_s10, 4  ;;  %s751_s28 = smov [#allocation2]   ;;  %s623_s27 = int_to_ptr.hbm [resolvable:$true] %s622_s27 }
   0xd   :  { %v80_v54 = vadd.f32 %v79_v44, %v78_v34  ;;  %v93_v55 = vrot.slane %v92_v47, 2  ;;  %v99_v56 = vadd.f32 %v98_v48, %v97_v41  ;;  %v53_v61 = vrot.slane %v52_v49, 1  ;;  %s620_s29 = sshll.u32 %s751_s28, 4  ;;  %s621_s29 = int_to_ptr.vmem [resolvable:$true] %s620_s29 }
   0xe   :  { %639 = vmatmul.msk.bf16.vlgmr.msra.gmra.mxu0 %vm145_vm2, %v132_v42  ;;  %v87_v57 = vadd.f32 %v86_v52, %v85_v45  ;;  %v60_v62 = vrot.slane %v59_v50, 1  ;;  %v105_v63 = vmul.f32 8.0, %v719_v37  ;;  %v67_v0 = vrot.slane %v66_v51, 1  ;;  %v704_v52 = vld [vmem:[%s1069_s6 + $0x18] sm:$0xff] }
   0xf   :  { %v94_v59 = vadd.f32 %v93_v55, %v92_v47  ;;  %v100_v60 = vrot.slane %v99_v56, 2  ;;  %v74_v1 = vrot.slane %v73_v53, 1  ;;  %v81_v2 = vrot.slane %v80_v54, 1  ;;  %302 = vmatpush.bf16.msra.mxu2 %v706_v58  ;;  %v701_v55 = vld [vmem:[%s1069_s6] sm:$0xff]  ;;  %v711_v58 = vld [vmem:[%s1071_s8 + $0x10] sm:$0xff] }
  0x10   :  { %v88_v4 = vrot.slane %v87_v57, 1  ;;  %v106_v6 = vsub.f32 1.0, %v105_v63  ;;  %v54_v9 = vadd.f32 %v53_v61, %v52_v49  ;;  %v61_v10 = vadd.f32 %v60_v62, %v59_v50 }
  0x11   :  { %v101_v3 = vadd.f32 %v100_v60, %v99_v56  ;;  %v95_v5 = vrot.slane %v94_v59, 1  ;;  %v68_v12 = vadd.f32 %v67_v0, %v66_v51  ;;  %v75_v13 = vadd.f32 %v74_v1, %v73_v53  ;;  %v703_v53 = vld [vmem:[%s1069_s6 + $0x10] sm:$0xff]  ;;  %v715_v60 = vld [vmem:[%s1068_s5] ss:$0 sm:$0xff] }
  0x12   :  { %v107_v11 = vmul.f32 %v719_v37, %v106_v6  ;;  %v82_v14 = vadd.f32 %v81_v2, %v80_v54  ;;  %vm109_vm3 = vweird.f32 %v719_v37  ;;  %v89_v15 = vadd.f32 %v88_v4, %v87_v57  ;;  %v702_v54 = vld [vmem:[%s1069_s6 + $0x8] sm:$0xff]  ;;  %v712_v57 = vld [vmem:[%s1071_s8 + $0x18] sm:$0xff]  ;;  %v709_v4 = vld [vmem:[%s1071_s8] sm:$0xff] }
  0x13   :  { %v102_v8 = vrot.slane %v101_v3, 1  ;;  %v96_v16 = vadd.f32 %v95_v5, %v94_v59  ;;  %303 = vmatpush.bf16.msra.mxu2 %v705_v7  ;;  %vm182_vm4 = vcmask 1041409   ;;  %vm184_vm5 = vcmask 1042434   ;;  %359 = vmatpush.bf16.msra.mxu3 %v712_v57  ;;  %v716_v5 = vld [vmem:[%s1070_s7] ss:$0 sm:$0xff] }
  0x14   :  { %v108_v18 = vadd.f32 %v719_v37, %v107_v11  ;;  %vm186_vm6 = vcmask 1043459   ;;  %vm188_vm7 = vcmask 1044484   ;;  %vm190_vm8 = vcmask 1045509   ;;  %v717_v11 = vld [vmem:[%s1072_s9] ss:$0 sm:$0xff] }
  0x15   :  { %v103_v17 = vadd.f32 %v102_v8, %v101_v3  ;;  %vm192_vm9 = vcmask 1046534   ;;  %vm194_vm10 = vcmask 1047559   ;;  %v710_v3 = vld [vmem:[%s1071_s8 + $0x8] sm:$0xff]  ;;  %vm351_vm11 = vcmask 523264  }
  0x16   :  { %v110_v19 = vsel %vm109_vm3, %v719_v37, %v108_v18  ;;  %vm429_vm12 = vcmask 257024   ;;  %vm513_vm13 = vcmask 130112   ;;  %vm613_vm1 = vcmask 7168  }
  0x17   :  { %v111_v20 = vmul.f32 %v110_v19, %v54_v9  ;;  %v112_v21 = vmul.f32 %v110_v19, %v61_v10  ;;  %v113_v22 = vmul.f32 %v110_v19, %v68_v12  ;;  %v114_v23 = vmul.f32 %v110_v19, %v75_v13  ;;  %304 = vmatpush.bf16.msra.mxu2 %v704_v52 }
  0x18   :  { %v115_v24 = vmul.f32 %v110_v19, %v82_v14  ;;  %v116_v25 = vmul.f32 %v110_v19, %v89_v15  ;;  %v117_v26 = vmul.f32 %v110_v19, %v96_v16  ;;  %v118_v27 = vmul.f32 %v110_v19, %v103_v17  ;;  %360 = vmatpush.bf16.msra.mxu3 %v711_v58  ;;  %v370_v15 = vld [vmem:[%s1065_s2] sm:$0xff] }
  0x19   :  { %v119_v28 = vpack.c.bf16 %v111_v20, %v111_v20  ;;  %v120_v29 = vpack.c.bf16 %v112_v21, %v112_v21  ;;  %v121_v30 = vpack.c.bf16 %v113_v22, %v113_v22  ;;  %v122_v31 = vpack.c.bf16 %v114_v23, %v114_v23  ;;  %v374_v19 = vld [vmem:[%s1065_s2 + $0x20] sm:$0xff]  ;;  %v372_v20 = vld [vmem:[%s1065_s2 + $0x10] sm:$0xff] }
  0x1a   :  { %v123_v32 = vpack.c.bf16 %v115_v24, %v115_v24  ;;  %v124_v33 = vpack.c.bf16 %v116_v25, %v116_v25  ;;  %v125_v34 = vpack.c.bf16 %v117_v26, %v117_v26  ;;  %v126_v35 = vpack.c.bf16 %v118_v27, %v118_v27 }
  0x1b   :  { %v174_v36 = vunpack.c.l.b16 %v119_v28  ;;  %v175_v37 = vunpack.c.l.b16 %v120_v29  ;;  %v176_v38 = vunpack.c.l.b16 %v121_v30  ;;  %v177_v39 = vunpack.c.l.b16 %v122_v31  ;;  %305 = vmatpush.bf16.msra.mxu2 %v703_v53  ;;  %v371_v28 = vld [vmem:[%s1065_s2 + $0x8] sm:$0xf] }
  0x1c   :  { %v178_v40 = vunpack.c.l.b16 %v123_v32  ;;  %v179_v41 = vunpack.c.l.b16 %v124_v33  ;;  %v180_v43 = vunpack.c.l.b16 %v125_v34  ;;  %v181_v45 = vunpack.c.l.b16 %v126_v35  ;;  %361 = vmatpush.bf16.msra.mxu3 %v710_v3  ;;  %v375_v31 = vld [vmem:[%s1065_s2 + $0x28] sm:$0xf]  ;;  %v373_v32 = vld [vmem:[%s1065_s2 + $0x18] sm:$0xf] }
  0x1d   :  { %v183_v42 = vsel %vm182_vm4, %v175_v37, %v174_v36 }
  0x1e   :  { %v185_v44 = vsel %vm184_vm5, %v176_v38, %v183_v42 }
  0x1f   :  { %v187_v46 = vsel %vm186_vm6, %v177_v39, %v185_v44  ;;  %306 = vmatpush.bf16.msra.mxu2 %v702_v54  ;;  %v378_v44 = vld [vmem:[%s1065_s2 + $0x40] sm:$0xff] }
  0x20   :  { %v189_v47 = vsel %vm188_vm7, %v178_v40, %v187_v46  ;;  %362 = vmatpush.bf16.msra.mxu3 %v709_v4  ;;  %v376_v40 = vld [vmem:[%s1065_s2 + $0x30] sm:$0xff] }
  0x21   :  { %v191_v48 = vsel %vm190_vm8, %v179_v41, %v189_v47  ;;  %v384_v4 = vld [vmem:[%s1065_s2 + $0x70] sm:$0xff] }
  0x22   :  { %v193_v49 = vsel %vm192_vm9, %v180_v43, %v191_v48 }
  0x23   :  { %v195_v50 = vsel %vm194_vm10, %v181_v45, %v193_v49  ;;  %307 = vmatpush.bf16.msra.mxu2 %v701_v55  ;;  %v377_v45 = vld [vmem:[%s1065_s2 + $0x38] sm:$0xf] }
  0x24   :  { %v196_v51 = vpack.c.b16 %v195_v50, %v195_v50  ;;  %v381_v55 = vld [vmem:[%s1065_s2 + $0x58] sm:$0xf] }
  0x26   :  { %648 = vmatmul.msk.bf16.vlgmr.msra.gmra.mxu1 %vm47_vm0, %v196_v51  ;;  %v379_v51 = vld [vmem:[%s1065_s2 + $0x48] sm:$0xf] }
  0x8b   :  { %v162_v56 = vpop.f32.mrf.mxu0 }
  0x93   :  { %v164_v59 = vpop.f32.mrf.mxu0 }
  0xa3   :  { %v221_v61 = vpop.f32.mrf.mxu1 }
  0xa4   :  { %v222_v62 = vadd.f32 %v221_v61, %v162_v56  ;;  %v380_v56 = vld [vmem:[%s1065_s2 + $0x50] sm:$0xff] }
  0xa6   :  { %v229_v63 = vadd.f32 %v715_v60, %v222_v62 }
  0xa8   :  { %v230_v0 = vmax.f32 %v229_v63, 0.0 }
  0xaa   :  { %v231_v1 = vpack.c.bf16 %v230_v0, %v230_v0  ;;  %v382_v0 = vld [vmem:[%s1065_s2 + $0x60] sm:$0xff] }
  0xab   :  { %v223_v2 = vpop.f32.mrf.mxu1 }
  0xac   :  { %308 = vmatmul.bf16.vlgmr.msra.gmra.mxu2 %v231_v1 }
 0x12f   :  { %v309_v6 = vpop.f32.mrf.mxu2 }
 0x130   :  { %v310_v7 = vadd.f32 %v716_v5, %v309_v6  ;;  %v383_v5 = vld [vmem:[%s1065_s2 + $0x68] sm:$0xf] }
 0x132   :  { %v313_v8 = vmax.f32 %v310_v7, 0.0 }
 0x134   :  { %v314_v9 = vpack.c.bf16 %v313_v8, %v313_v8 }
 0x136   :  { %697 = vmatmul.msk.bf16.vlgmr.msra.gmra.mxu3 %vm351_vm11, %v314_v9 }
 0x137   :  { %v311_v10 = vpop.f32.mrf.mxu2 }
 0x138   :  { %v385_v10 = vld [vmem:[%s1065_s2 + $0x78] sm:$0xf] }
 0x1b9   :  { %v364_v12 = vpop.f32.mrf.mxu3 }
 0x1ba   :  { %v365_v13 = vadd.f32 %v717_v11, %v364_v12 }
 0x1bc   :  { %v913_v14 = vmax.f32 %v365_v13, 0.0 }
 0x1be   :  { %369 = vst.msk [vmem:[#allocation2] sm:$0xff] %vm47_vm0, %v913_v14  ;;  %v394_v16 = vperm.slane %v913_v14, 0  ;;  %v388_v17 = vrot.slane %v913_v14, 2  ;;  %v387_v18 = vrot.slane %v913_v14, 1  ;;  %v389_v34 = vrot.slane %v913_v14, 3 }
 0x1bf   :  { %v390_v37 = vrot.slane %v913_v14, 4  ;;  %v391_v49 = vrot.slane %v913_v14, 5  ;;  %v392_v58 = vrot.slane %v913_v14, 6  ;;  %v393_v61 = vrot.slane %v913_v14, 7  ;;  %625 = dma.vmem_to_hbm [thread:$0]  %s621_s29, 128, %s623_s27, [#allocation3]  }
 0x1c0   :  { %v410_v21 = vmul.f32 %v394_v16, %v370_v15  ;;  %v396_v22 = vperm.slane %v388_v17, 0  ;;  %v395_v23 = vperm.slane %v387_v18, 0  ;;  %v411_v33 = vmul.f32 %v394_v16, %v371_v28 }
 0x1c1   :  { %v366_v24 = vpop.f32.mrf.mxu3  ;;  %v397_v39 = vperm.slane %v389_v34, 0  ;;  %v398_v43 = vperm.slane %v390_v37, 0  ;;  %v399_v54 = vperm.slane %v391_v49, 0  ;;  %v400_v63 = vperm.slane %v392_v58, 0 }
 0x1c2   :  { %v426_v25 = vsel %vm47_vm0, %v410_v21, 0.0  ;;  %v414_v26 = vmul.f32 %v396_v22, %v374_v19  ;;  %v412_v27 = vmul.f32 %v395_v23, %v372_v20  ;;  %v415_v35 = vmul.f32 %v396_v22, %v375_v31 }
 0x1c3   :  { %427 = vadd.xlane.f32.xlu0 %v426_v25  ;;  %v413_v36 = vmul.f32 %v395_v23, %v373_v32  ;;  %v430_v38 = vsel %vm429_vm12, %v411_v33, 0.0  ;;  %v416_v46 = vmul.f32 %v397_v39, %v376_v40  ;;  %v418_v47 = vmul.f32 %v398_v43, %v378_v44 }
 0x1c4   :  { %v439_v29 = vsel %vm47_vm0, %v414_v26, 0.0  ;;  %v433_v30 = vsel %vm47_vm0, %v412_v27, 0.0  ;;  %v442_v41 = vsel %vm429_vm12, %v415_v35, 0.0  ;;  %v417_v48 = vmul.f32 %v397_v39, %v377_v45 }
 0x1c5   :  { %440 = vadd.xlane.f32.xlu2 %v439_v29  ;;  %434 = vadd.xlane.f32.xlu1 %v433_v30  ;;  %v436_v42 = vsel %vm429_vm12, %v413_v36, 0.0  ;;  %v445_v50 = vsel %vm47_vm0, %v416_v46, 0.0  ;;  %v451_v52 = vsel %vm47_vm0, %v418_v47, 0.0  ;;  %v419_v57 = vmul.f32 %v398_v43, %v379_v51 }
 0x1c6   :  { %v448_v53 = vsel %vm429_vm12, %v417_v48, 0.0  ;;  %v421_v59 = vmul.f32 %v399_v54, %v381_v55  ;;  %v420_v60 = vmul.f32 %v399_v54, %v380_v56  ;;  %v401_v3 = vperm.slane %v393_v61, 0 }
 0x1c7   :  { %v454_v62 = vsel %vm429_vm12, %v419_v57, 0.0  ;;  %v422_v6 = vmul.f32 %v400_v63, %v382_v0  ;;  %v423_v8 = vmul.f32 %v400_v63, %v383_v5  ;;  %v475_v21 = vlaneseq }
 0x1c8   :  { %v460_v1 = vsel %vm429_vm12, %v421_v59, 0.0  ;;  %v457_v2 = vsel %vm47_vm0, %v420_v60, 0.0  ;;  %v424_v7 = vmul.f32 %v401_v3, %v384_v4  ;;  %v425_v13 = vmul.f32 %v401_v3, %v385_v10 }
 0x1c9   :  { %v463_v9 = vsel %vm47_vm0, %v422_v6, 0.0  ;;  %v466_v12 = vsel %vm429_vm12, %v423_v8, 0.0  ;;  %v989_v25 = vand.u32 127, %v475_v21 }
 0x1ca   :  { %v469_v11 = vsel %vm47_vm0, %v424_v7, 0.0  ;;  %v472_v14 = vsel %vm429_vm12, %v425_v13, 0.0  ;;  %vm608_vm0 = vcmask 97280  }
 0x1cb   :  { %431 = vadd.xlane.f32.xlu0 %v430_v38  ;;  %v992_v26 = vadd.s32 4294967288, %v989_v25  ;;  %vm477_vm14 = vcmp.lt.s32.totalorder %v989_v25, 2 }
 0x1cd   :  { %443 = vadd.xlane.f32.xlu2 %v442_v41  ;;  %437 = vadd.xlane.f32.xlu1 %v436_v42 }
 0x1d3   :  { %446 = vadd.xlane.f32.xlu0 %v445_v50 }
 0x1d5   :  { %452 = vadd.xlane.f32.xlu2 %v451_v52  ;;  %449 = vadd.xlane.f32.xlu1 %v448_v53 }
 0x1db   :  { %455 = vadd.xlane.f32.xlu0 %v454_v62 }
 0x1dd   :  { %461 = vadd.xlane.f32.xlu2 %v460_v1  ;;  %458 = vadd.xlane.f32.xlu1 %v457_v2 }
 0x1e3   :  { %464 = vadd.xlane.f32.xlu0 %v463_v9 }
 0x1e5   :  { %470 = vadd.xlane.f32.xlu2 %v469_v11  ;;  %467 = vadd.xlane.f32.xlu1 %v466_v12 }
 0x1eb   :  { %473 = vadd.xlane.f32.xlu0 %v472_v14 }
 0x236   :  { %v428_v15 = vpop.xlane.xlu0 %427 }
 0x237   :  { %v478_v28 = vsub.f32 0.0, %v428_v15  ;;  %v510_v38 = vperm.slane %v428_v15, %v989_v25 }
 0x238   :  { %v441_v16 = vpop.xlane.xlu2 %440  ;;  %v435_v17 = vpop.xlane.xlu1 %434 }
 0x239   :  { %v480_v31 = vsub.f32 0.0, %v435_v17  ;;  %v482_v32 = vsub.f32 0.0, %v441_v16  ;;  %v560_v41 = vperm.slane %v478_v28, %v989_v25  ;;  %v515_v42 = vperm.slane %v435_v17, %v989_v25 }
 0x23a   :  { %v518_v45 = vperm.slane %v441_v16, %v989_v25 }
 0x23b   :  { %v563_v46 = vperm.slane %v480_v31, %v989_v25  ;;  %v566_v49 = vperm.slane %v482_v32, %v989_v25 }
 0x23e   :  { %v432_v18 = vpop.xlane.xlu0 %431 }
 0x23f   :  { %v479_v29 = vsub.f32 0.0, %v432_v18  ;;  %v512_v33 = vperm.slane %v432_v18, %v992_v26 }
 0x240   :  { %v444_v19 = vpop.xlane.xlu2 %443  ;;  %v438_v20 = vpop.xlane.xlu1 %437 }
 0x241   :  { %v481_v27 = vsub.f32 0.0, %v438_v20  ;;  %v483_v34 = vsub.f32 0.0, %v444_v19  ;;  %v516_v35 = vperm.slane %v438_v20, %v992_v26  ;;  %v561_v43 = vperm.slane %v479_v29, %v992_v26 }
 0x242   :  { %v519_v44 = vperm.slane %v444_v19, %v992_v26  ;;  %v514_v50 = vsel %vm513_vm13, %v512_v33, %v510_v38 }
 0x243   :  { %v564_v39 = vperm.slane %v481_v27, %v992_v26  ;;  %v567_v51 = vperm.slane %v483_v34, %v992_v26  ;;  %v517_v52 = vsel %vm513_vm13, %v516_v35, %v515_v42  ;;  %v562_v57 = vsel %vm513_vm13, %v561_v43, %v560_v41 }
 0x244   :  { %v520_v58 = vsel %vm513_vm13, %v519_v44, %v518_v45  ;;  %v536_v3 = vsel %vm182_vm4, %v517_v52, %v514_v50 }
 0x245   :  { %v565_v53 = vsel %vm513_vm13, %v564_v39, %v563_v46  ;;  %v568_v2 = vsel %vm513_vm13, %v567_v51, %v566_v49  ;;  %v537_v16 = vsel %vm184_vm5, %v520_v58, %v536_v3 }
 0x246   :  { %v447_v22 = vpop.xlane.xlu0 %446  ;;  %v584_v4 = vsel %vm182_vm4, %v565_v53, %v562_v57 }
 0x247   :  { %v484_v47 = vsub.f32 0.0, %v447_v22  ;;  %v521_v59 = vperm.slane %v447_v22, %v989_v25  ;;  %v585_v20 = vsel %vm184_vm5, %v568_v2, %v584_v4 }
 0x248   :  { %v453_v23 = vpop.xlane.xlu2 %452  ;;  %v450_v24 = vpop.xlane.xlu1 %449 }
 0x249   :  { %v485_v40 = vsub.f32 0.0, %v450_v24  ;;  %v486_v54 = vsub.f32 0.0, %v453_v23  ;;  %v522_v55 = vperm.slane %v450_v24, %v992_v26  ;;  %v569_v62 = vperm.slane %v484_v47, %v989_v25 }
 0x24a   :  { %v524_v5 = vperm.slane %v453_v23, %v989_v25 }
 0x24b   :  { %v570_v56 = vperm.slane %v485_v40, %v992_v26  ;;  %v572_v7 = vperm.slane %v486_v54, %v989_v25  ;;  %v523_v8 = vsel %vm513_vm13, %v522_v55, %v521_v59 }
 0x24c   :  { %v538_v21 = vsel %vm186_vm6, %v523_v8, %v537_v16 }
 0x24d   :  { %v571_v9 = vsel %vm513_vm13, %v570_v56, %v569_v62 }
 0x24e   :  { %v456_v30 = vpop.xlane.xlu0 %455  ;;  %v586_v24 = vsel %vm186_vm6, %v571_v9, %v585_v20 }
 0x24f   :  { %v487_v48 = vsub.f32 0.0, %v456_v30  ;;  %v525_v60 = vperm.slane %v456_v30, %v992_v26 }
 0x250   :  { %v462_v36 = vpop.xlane.xlu2 %461  ;;  %v459_v37 = vpop.xlane.xlu1 %458 }
 0x251   :  { %v573_v63 = vperm.slane %v487_v48, %v992_v26  ;;  %v489_v0 = vsub.f32 0.0, %v462_v36  ;;  %v488_v1 = vsub.f32 0.0, %v459_v37  ;;  %v526_v11 = vsel %vm513_vm13, %v525_v60, %v524_v5 }
 0x252   :  { %v528_v12 = vperm.slane %v462_v36, %v992_v26  ;;  %v527_v13 = vperm.slane %v459_v37, %v989_v25  ;;  %v539_v27 = vsel %vm188_vm7, %v526_v11, %v538_v21 }
 0x253   :  { %v574_v17 = vsel %vm513_vm13, %v573_v63, %v572_v7  ;;  %v576_v18 = vperm.slane %v489_v0, %v992_v26  ;;  %v575_v19 = vperm.slane %v488_v1, %v989_v25 }
 0x254   :  { %v587_v29 = vsel %vm188_vm7, %v574_v17, %v586_v24  ;;  %v529_v30 = vsel %vm513_vm13, %v528_v12, %v527_v13 }
 0x255   :  { %v577_v34 = vsel %vm513_vm13, %v576_v18, %v575_v19  ;;  %v540_v43 = vsel %vm190_vm8, %v529_v30, %v539_v27 }
 0x256   :  { %v465_v61 = vpop.xlane.xlu0 %464  ;;  %v588_v44 = vsel %vm190_vm8, %v577_v34, %v587_v29 }
 0x257   :  { %v490_v14 = vsub.f32 0.0, %v465_v61  ;;  %v530_v31 = vperm.slane %v465_v61, %v989_v25 }
 0x258   :  { %v468_v6 = vpop.xlane.xlu1 %467  ;;  %v471_v15 = vpop.xlane.xlu2 %470 }
 0x259   :  { %v491_v10 = vsub.f32 0.0, %v468_v6  ;;  %v531_v22 = vperm.slane %v468_v6, %v992_v26  ;;  %v492_v28 = vsub.f32 0.0, %v471_v15  ;;  %v578_v32 = vperm.slane %v490_v14, %v989_v25 }
 0x25a   :  { %v533_v35 = vperm.slane %v471_v15, %v989_v25 }
 0x25b   :  { %v579_v23 = vperm.slane %v491_v10, %v992_v26  ;;  %v532_v38 = vsel %vm513_vm13, %v531_v22, %v530_v31  ;;  %v581_v40 = vperm.slane %v492_v28, %v989_v25 }
 0x25c   :  { %v541_v45 = vsel %vm192_vm9, %v532_v38, %v540_v43 }
 0x25d   :  { %v580_v39 = vsel %vm513_vm13, %v579_v23, %v578_v32 }
 0x25e   :  { %v474_v33 = vpop.xlane.xlu0 %473  ;;  %v589_v47 = vsel %vm192_vm9, %v580_v39, %v588_v44 }
 0x25f   :  { %v493_v36 = vsub.f32 0.0, %v474_v33  ;;  %v534_v37 = vperm.slane %v474_v33, %v992_v26 }
 0x261   :  { %v535_v41 = vsel %vm513_vm13, %v534_v37, %v533_v35  ;;  %v582_v42 = vperm.slane %v493_v36, %v992_v26 }
 0x262   :  { %v542_v48 = vsel %vm194_vm10, %v535_v41, %v541_v45 }
 0x263   :  { %v583_v46 = vsel %vm513_vm13, %v582_v42, %v581_v40 }
 0x264   :  { %v590_v49 = vsel %vm194_vm10, %v583_v46, %v589_v47 }
 0x265   :  { %v592_v50 = vsel %vm477_vm14, %v542_v48, %v590_v49 }
 0x266   :  { %v594_v51 = vand.u32 2147483647, %v592_v50  ;;  %v593_v60 = vmin.f32 %v592_v50, 0.0 }
 0x268   :  { %v595_v52 = vsub.f32 0.0, %v594_v51 }
 0x26a   :  { %v596_v26 = vmul.f32 1.442695, %v595_v52 }
 0x26c   :  { %720 = vpow2.f32 %v596_v26 }
 0x272   :  { %v721_v53 = vpop.eup %720 }
 0x273   :  { %v598_v54 = vadd.f32 1.0, %v721_v53  ;;  %v601_v55 = vmul.f32 -0.5, %v721_v53  ;;  %v604_v56 = vand.u32 2147483647, %v721_v53 }
 0x275   :  { %722 = vlog2.f32 %v598_v54  ;;  %v602_v25 = vadd.f32 1.0, %v601_v55  ;;  %vm605_vm15 = vcmp.lt.f32.partialorder %v604_v56, 0.0004427343 }
 0x277   :  { %v603_v59 = vmul.f32 %v721_v53, %v602_v25 }
 0x27b   :  { %v723_v57 = vpop.eup %722 }
 0x27c   :  { %v600_v58 = vmul.f32 0.6931472, %v723_v57 }
 0x27e   :  { %v606_v61 = vsel %vm605_vm15, %v603_v59, %v600_v58 }
 0x27f   :  { %v607_v62 = vsub.f32 %v593_v60, %v606_v61 }
 0x281   :  { %v609_v63 = vsel %vm608_vm0, %v607_v62, 0.0 }
 0x282   :  { %610 = vadd.xlane.f32.xlu1 %v609_v63 }
 0x2f5   :  { %v611_v0 = vpop.xlane.xlu1 %610 }
 0x2f6   :  { %v612_v1 = vmul.f32 0.5, %v611_v0 }
 0x2f8   :  { %614 = vst.msk [vmem:[%s1074_s11] sm:$0xff] %vm613_vm1, %v612_v1 }
 0x2f9   :  { %748 = dma.done.wait [#allocation3], 128  }
 0x2fa   :  { %749 = vsyncadd [#allocation3], 4294967168 }
 0x2fb   :  { %634 = vsyncpa [#allocation3], 1 }

</bundles_post_ra>
